<compile_context>
chip_gen: v7x
topology: tpu7x:2x2x1
jax: 0.10.0
libtpu: 0.0.40
codegen_flags: <defaults>
</compile_context>

<pallas_src>
import jax
import jax.numpy as jnp
from jax.experimental import pallas as pl
from jax.experimental.pallas import tpu as pltpu


def fusion_kernel(x1_ref, x2_ref, wt1_ref, wt2_ref, shift_ref, out_ref):
    # x1_ref: (tm, F1)   x2_ref: (tm, F2)
    # wt1_ref: (F1, C)   wt2_ref: (F2, C)   == rows of (scale * W)^T
    # shift_ref: (1, C)  folded BN shift (f32)
    # out_ref: (tm, C)
    x1 = x1_ref[...]
    x2 = x2_ref[...]
    f1 = x1.shape[-1]

    # 1x1 Conv1d (bias=False) with BN scale folded in: two MXU dots, f32 accum.
    conv = (jnp.dot(x1, wt1_ref[...], preferred_element_type=jnp.float32)
            + jnp.dot(x2, wt2_ref[...], preferred_element_type=jnp.float32))

    # folded BN shift + sigmoid (VPU / EUP), kept in f32
    att = jax.nn.sigmoid(conv + shift_ref[...])                      # (tm, C)

    # gated identity, stored as the two halves (no in-kernel concat);
    # multiply in f32, single down-cast at the store.
    out_ref[:, :f1] = (x1 * att[:, :f1]).astype(out_ref.dtype)
    out_ref[:, f1:] = (x2 * att[:, f1:]).astype(out_ref.dtype)


def _pick_tile_m(m, c, itemsize):
    """Byte-budgeted row tile: ~2 MiB output block, sublane-pack aligned."""
    pack = max(8, 32 // itemsize)          # 8 rows f32, 16 bf16, 32 int8/fp8
    if m <= pack:
        return m                           # full-extent block (always legal)
    target_out_bytes = 2 * 1024 * 1024     # well past the measured roofline knee
    tm = (target_out_bytes // max(1, c * itemsize)) // pack * pack
    tm = max(pack, min(tm, 128 * 1024))
    if tm >= m:
        return m                           # one block covers everything
    return tm


def fusion_forward(x1, x2, conv_w, gamma, beta, run_mean, run_var, eps=1e-3):
    B, N, F1 = x1.shape
    B2, N2, F2 = x2.shape
    assert (B, N) == (B2, N2)
    C = F1 + F2
    out_dtype = jnp.promote_types(x1.dtype, x2.dtype)
    itemsize = jnp.dtype(out_dtype).itemsize

    # ---- tiny parameter prep in plain JAX: fold eval-mode BN into the conv ----
    inv_std = jax.lax.rsqrt(run_var.astype(jnp.float32) + eps)
    scale = gamma.astype(jnp.float32) * inv_std                          # (C,)
    shift = (beta.astype(jnp.float32)
             - run_mean.astype(jnp.float32) * scale).reshape(1, C)       # (1, C)
    w2d = conv_w.reshape(C, C).astype(jnp.float32)                       # (C_out, C_in)
    wt = jnp.transpose(scale[:, None] * w2d)                             # (C_in, C_out)
    # matmul runs in the activation dtype when sub-f32 (bf16 MXU path)
    mat_dtype = out_dtype if itemsize < 4 else jnp.float32
    wt1 = wt[:F1].astype(mat_dtype)                                      # (F1, C)
    wt2 = wt[F1:].astype(mat_dtype)                                      # (F2, C)

    # ---- flatten (B, N) -> rows; byte-budgeted 1-D parallel grid ----
    M = B * N
    x1f = x1.reshape(M, F1).astype(out_dtype)
    x2f = x2.reshape(M, F2).astype(out_dtype)

    tm = _pick_tile_m(M, C, itemsize)
    grid = (pl.cdiv(M, tm),)

    # VMEM budget: double-buffered x1/x2/out tiles + resident params + slack.
    tile_bytes = tm * (F1 + F2 + C) * itemsize
    param_bytes = (F1 * C + F2 * C) * jnp.dtype(mat_dtype).itemsize + C * 4
    vmem_needed = 2 * tile_bytes + 2 * param_bytes + (1 << 20)
    vmem_limit = int(min(max(vmem_needed, 16 * 1024 * 1024), 48 * 1024 * 1024))

    cost = pl.CostEstimate(
        flops=2 * M * C * C + 2 * M * C,
        transcendentals=M * C,
        bytes_accessed=2 * M * C * itemsize + (C * C + C) * 4,
    )

    out_flat = pl.pallas_call(
        fusion_kernel,
        out_shape=jax.ShapeDtypeStruct((M, C), out_dtype),
        grid=grid,
        in_specs=[
            pl.BlockSpec((tm, F1), lambda i: (i, 0)),    # x1 row tile
            pl.BlockSpec((tm, F2), lambda i: (i, 0)),    # x2 row tile
            pl.BlockSpec((F1, C), lambda i: (0, 0)),     # scaled W^T rows for x1 (resident)
            pl.BlockSpec((F2, C), lambda i: (0, 0)),     # scaled W^T rows for x2 (resident)
            pl.BlockSpec((1, C), lambda i: (0, 0)),      # folded BN shift (resident)
        ],
        out_specs=pl.BlockSpec((tm, C), lambda i: (i, 0)),
        compiler_params=pltpu.CompilerParams(
            dimension_semantics=("parallel",),
            vmem_limit_bytes=vmem_limit,
        ),
        cost_estimate=cost,
    )(x1f, x2f, wt1, wt2, shift)

    return out_flat.reshape(B, N, C)


def fusion_reference(x1, x2, conv_w, gamma, beta, run_mean, run_var, eps=1e-3):
    # straight transcription of the PyTorch forward (eval-mode BN)
    x = jnp.concatenate([x1, x2], axis=2)
    identity = jnp.transpose(x, (0, 2, 1))                               # (B, C, N)
    C = identity.shape[1]
    w2d = conv_w.reshape(C, C)
    conv = jnp.einsum("oc,bcn->bon", w2d, identity)
    bn = (conv - run_mean[None, :, None]) / jnp.sqrt(run_var[None, :, None] + eps)
    bn = bn * gamma[None, :, None] + beta[None, :, None]
    w = jax.nn.sigmoid(bn)
    return jnp.transpose(identity * w, (0, 2, 1))


if __name__ == "__main__":
    # small shapes: batch=2, seq=16, features 4+4 -> channel=8
    B, N, F1, F2 = 2, 16, 4, 4
    C = F1 + F2

    key = jax.random.PRNGKey(0)
    k1, k2, k3, k4, k5, k6, k7 = jax.random.split(key, 7)

    x1 = jax.random.normal(k1, (B, N, F1), dtype=jnp.float32)
    x2 = jax.random.normal(k2, (B, N, F2), dtype=jnp.float32)

    # Conv1d weight (C, C, 1), bias=False; BatchNorm1d(C, eps=0.001) params
    conv_w = 0.1 * jax.random.normal(k3, (C, C, 1), dtype=jnp.float32)
    gamma = 1.0 + 0.1 * jax.random.normal(k4, (C,), dtype=jnp.float32)
    beta = 0.1 * jax.random.normal(k5, (C,), dtype=jnp.float32)
    run_mean = 0.1 * jax.random.normal(k6, (C,), dtype=jnp.float32)
    run_var = 0.5 + jax.random.uniform(k7, (C,), dtype=jnp.float32)

    out = fusion_forward(x1, x2, conv_w, gamma, beta, run_mean, run_var)
    out = jax.block_until_ready(out)

    ref = fusion_reference(x1, x2, conv_w, gamma, beta, run_mean, run_var)
    assert out.shape == (B, N, C), out.shape
    assert jnp.allclose(out, ref, atol=1e-5, rtol=1e-5), "mismatch vs reference"

    print("KERNEL_OK")
</pallas_src>

<mosaic_0001>
module attributes {stable_mosaic.version = 11 : i64} {
  func.func @fusion_kernel(%arg0: i32, %arg1: memref<32x4xf32, #tpu.memory_space<vmem>>, %arg2: memref<32x4xf32, #tpu.memory_space<vmem>>, %arg3: memref<4x8xf32, #tpu.memory_space<vmem>>, %arg4: memref<4x8xf32, #tpu.memory_space<vmem>>, %arg5: memref<1x8xf32, #tpu.memory_space<vmem>>, %arg6: memref<32x8xf32, #tpu.memory_space<vmem>>) attributes {dimension_semantics = [#tpu.dimension_semantics<parallel>], iteration_bounds = array<i64: 1>, scalar_prefetch = 0 : i64, scratch_operands = 0 : i64, tpu.core_type = #tpu.core_type<tc>, window_params = [{transform_indices = @transform_0, window_bounds = array<i64: 32, 4>}, {transform_indices = @transform_1, window_bounds = array<i64: 32, 4>}, {pipeline_mode = #tpu.pipeline_mode<synchronous>, transform_indices = @transform_2, window_bounds = array<i64: 4, 8>}, {pipeline_mode = #tpu.pipeline_mode<synchronous>, transform_indices = @transform_3, window_bounds = array<i64: 4, 8>}, {pipeline_mode = #tpu.pipeline_mode<synchronous>, transform_indices = @transform_4, window_bounds = array<i64: 1, 8>}, {transform_indices = @transform_5, window_bounds = array<i64: 32, 8>}]} {
    %c0 = arith.constant 0 : index
    %c0_0 = arith.constant 0 : index
    %0 = vector.load %arg1[%c0, %c0_0] : memref<32x4xf32, #tpu.memory_space<vmem>>, vector<32x4xf32>
    %c0_1 = arith.constant 0 : index
    %c0_2 = arith.constant 0 : index
    %1 = vector.load %arg2[%c0_1, %c0_2] : memref<32x4xf32, #tpu.memory_space<vmem>>, vector<32x4xf32>
    %c0_3 = arith.constant 0 : index
    %c0_4 = arith.constant 0 : index
    %2 = vector.load %arg3[%c0_3, %c0_4] : memref<4x8xf32, #tpu.memory_space<vmem>>, vector<4x8xf32>
    %cst = arith.constant dense<0.000000e+00> : vector<32x8xf32>
    %3 = tpu.matmul %0, %2, %cst {dimension_numbers = #tpu.dot_dimension_numbers<[1], [0], [0], [1], [0, 0, 1, 1], [], []>} : vector<32x4xf32>, vector<4x8xf32>, vector<32x8xf32> -> vector<32x8xf32>
    %c0_5 = arith.constant 0 : index
    %c0_6 = arith.constant 0 : index
    %4 = vector.load %arg4[%c0_5, %c0_6] : memref<4x8xf32, #tpu.memory_space<vmem>>, vector<4x8xf32>
    %cst_7 = arith.constant dense<0.000000e+00> : vector<32x8xf32>
    %5 = tpu.matmul %1, %4, %cst_7 {dimension_numbers = #tpu.dot_dimension_numbers<[1], [0], [0], [1], [0, 0, 1, 1], [], []>} : vector<32x4xf32>, vector<4x8xf32>, vector<32x8xf32> -> vector<32x8xf32>
    %6 = arith.addf %3, %5 : vector<32x8xf32>
    %c0_8 = arith.constant 0 : index
    %c0_9 = arith.constant 0 : index
    %7 = vector.load %arg5[%c0_8, %c0_9] : memref<1x8xf32, #tpu.memory_space<vmem>>, vector<1x8xf32>
    %8 = vector.broadcast %7 : vector<1x8xf32> to vector<32x8xf32>
    %9 = arith.addf %6, %8 : vector<32x8xf32>
    %10 = arith.negf %9 : vector<32x8xf32>
    %11 = math.exp %10 : vector<32x8xf32>
    %cst_10 = arith.constant 1.000000e+00 : f32
    %12 = vector.broadcast %cst_10 : f32 to vector<32x8xf32>
    %13 = arith.addf %12, %11 : vector<32x8xf32>
    %14 = arith.divf %12, %13 : vector<32x8xf32>
    %15 = vector.extract_strided_slice %14 {offsets = [0, 0], sizes = [32, 4], strides = [1, 1]} : vector<32x8xf32> to vector<32x4xf32>
    %16 = arith.mulf %0, %15 : vector<32x4xf32>
    %c0_11 = arith.constant 0 : index
    %c0_12 = arith.constant 0 : index
    %17 = vector.load %arg6[%c0_11, %c0_12] : memref<32x8xf32, #tpu.memory_space<vmem>>, vector<32x4xf32>
    tpu.vector_store %arg6[%c0_11, %c0_12], %16 {strides = array<i32>} : memref<32x8xf32, #tpu.memory_space<vmem>>, vector<32x4xf32>,
    %18 = vector.extract_strided_slice %14 {offsets = [0, 4], sizes = [32, 4], strides = [1, 1]} : vector<32x8xf32> to vector<32x4xf32>
    %19 = arith.mulf %1, %18 : vector<32x4xf32>
    %c0_13 = arith.constant 0 : index
    %c4 = arith.constant 4 : index
    %20 = vector.load %arg6[%c0_13, %c4] : memref<32x8xf32, #tpu.memory_space<vmem>>, vector<32x4xf32>
    tpu.vector_store %arg6[%c0_13, %c4], %19 {strides = array<i32>} : memref<32x8xf32, #tpu.memory_space<vmem>>, vector<32x4xf32>,
    return
  }
  func.func @transform_0(%arg0: i32) -> (i32, i32) {
    %c0_i32 = arith.constant 0 : i32
    %c0_i32_0 = arith.constant 0 : i32
    return %arg0, %c0_i32 : i32, i32
  }
  func.func @transform_1(%arg0: i32) -> (i32, i32) {
    %c0_i32 = arith.constant 0 : i32
    %c0_i32_0 = arith.constant 0 : i32
    return %arg0, %c0_i32 : i32, i32
  }
  func.func @transform_2(%arg0: i32) -> (i32, i32) {
    %c0_i32 = arith.constant 0 : i32
    %c0_i32_0 = arith.constant 0 : i32
    %c0_i32_1 = arith.constant 0 : i32
    return %c0_i32, %c0_i32_0 : i32, i32
  }
  func.func @transform_3(%arg0: i32) -> (i32, i32) {
    %c0_i32 = arith.constant 0 : i32
    %c0_i32_0 = arith.constant 0 : i32
    %c0_i32_1 = arith.constant 0 : i32
    return %c0_i32, %c0_i32_0 : i32, i32
  }
  func.func @transform_4(%arg0: i32) -> (i32, i32) {
    %c0_i32 = arith.constant 0 : i32
    %c0_i32_0 = arith.constant 0 : i32
    %c0_i32_1 = arith.constant 0 : i32
    return %c0_i32, %c0_i32_0 : i32, i32
  }
  func.func @transform_5(%arg0: i32) -> (i32, i32) {
    %c0_i32 = arith.constant 0 : i32
    %c0_i32_0 = arith.constant 0 : i32
    return %arg0, %c0_i32 : i32, i32
  }
}

</mosaic_0001>

<bundles_post_ra>
// kernel: tpu_custom_call.1
= control target key start
LH: loop header
LB: loop body
LE: loop exit
PB: predicated region body
PF: predicated region fallthrough
CT: control target
= control target key end

     0   :  { %vm43_vm0 = vcmask 1043456   ;;  %vm30_vm1 = vcmask 31744   ;;  %s384_s19 = smov 4   ;;  %vm311_vm2 = vcmask 64544   ;;  %s508_s3 = inlined_call_operand.vmem [shape: f32[4,8], index: 3, kind: input, shape index: {}]   ;;  %s509_s2 = inlined_call_operand.vmem [shape: f32[4,8], index: 2, kind: input, shape index: {}]   ;;  %s510_s1 = inlined_call_operand.vmem [shape: f32[32,4], index: 1, kind: input, shape index: {}]   ;;  %s511_s0 = inlined_call_operand.vmem [shape: f32[32,4], index: 0, kind: input, shape index: {}]   ;;  %s512_s4 = inlined_call_operand.vmem [shape: f32[1,8], index: 4, kind: input, shape index: {}]   ;;  %s513_s5 = inlined_call_operand.vmem [shape: f32[32,8], index: 5, kind: output, shape index: {}]  }
   0x1   :  { %v29_v0 = vld [vmem:[%s508_s3] sm:$0xf]  ;;  %v434_v4 = vld [vmem:[%s510_s1 + $0x8] sm:$0xff]  ;;  %v445_v6 = vld [vmem:[%s510_s1 + $0x10] sm:$0xff] }
   0x2   :  { %v28_v1 = vld [vmem:[%s509_s2] sm:$0xf]  ;;  %345 = vmatprep.subr.msk.mxu1 %vm43_vm0, %v29_v0  ;;  %v21_v5 = vld [vmem:[%s511_s0 + $0x8] sm:$0xff]  ;;  %v450_v7 = vld [vmem:[%s511_s0 + $0x10] sm:$0xff] }
   0x3   :  { %v424_v2 = vld [vmem:[%s510_s1] sm:$0xff]  ;;  %353 = vmatprep.subr.msk.mxu0 %vm43_vm0, %v28_v1  ;;  %346 = vmatpush3.msk.msra.mxu1 %vm43_vm0, %v29_v0  ;;  %v464_v8 = vld [vmem:[%s510_s1 + $0x18] sm:$0xff] }
   0x4   :  { %v20_v3 = vld [vmem:[%s511_s0] sm:$0xff]  ;;  %347 = vmatprep.mubr.msk.f32.mxu1 %vm30_vm1, %v424_v2  ;;  %354 = vmatpush3.msk.msra.mxu0 %vm43_vm0, %v28_v1  ;;  %v23_v9 = vld [vmem:[%s511_s0 + $0x18] sm:$0xff]  ;;  %s383_s0 = smov 124  }
   0x5   :  { %355 = vmatprep.mubr.msk.f32.mxu0 %vm30_vm1, %v20_v3  ;;  %348 = vmatmul.mubr.msk.f32.vlgmr.msra.gmra.mrb[0].mxu1 %vm30_vm1, %v434_v4  ;;  %v330_v12 = vld [vmem:[%s512_s4] ss:$0 sm:$0xff] }
   0x6   :  { %356 = vmatmul.mubr.msk.f32.vlgmr.msra.gmra.mrb[0].mxu0 %vm30_vm1, %v21_v5  ;;  %350 = vmatprep.mubr.msk.f32.mxu1 %vm30_vm1, %v445_v6 }
   0x7   :  { %358 = vmatprep.mubr.msk.f32.mxu0 %vm30_vm1, %v450_v7 }
   0x9   :  { %351 = vmatmul.mubr.msk.f32.gmra.mrb[2].mxu1 %vm30_vm1, %v464_v8 }
   0xa   :  { %359 = vmatmul.mubr.msk.f32.gmra.mrb[2].mxu0 %vm30_vm1, %v23_v9 }
  0xd8   :  { %v349_v10 = vpop.f32.mrb[0].mxu1 }
  0xd9   :  { %v357_v11 = vpop.f32.mrb[0].mxu0  ;;  %v113_v14 = vpop.f32.mrb[1].mxu1 }
  0xda   :  { %v219_v13 = vadd.f32 %v357_v11, %v349_v10  ;;  %v213_v15 = vpop.f32.mrb[1].mxu0 }
  0xdb   :  { %v214_v16 = vadd.f32 %v213_v15, %v113_v14 }
  0xdc   :  { %v240_v17 = vadd.f32 %v330_v12, %v219_v13  ;;  %v352_v19 = vpop.f32.mrb[2].mxu1 }
  0xdd   :  { %v239_v18 = vadd.f32 %v330_v12, %v214_v16  ;;  %v360_v20 = vpop.f32.mrb[2].mxu0  ;;  %v123_v23 = vpop.f32.mrb[3].mxu1 }
  0xde   :  { %v332_v21 = vmul.f32 -1.442695, %v240_v17  ;;  %v229_v22 = vadd.f32 %v360_v20, %v352_v19  ;;  %v223_v24 = vpop.f32.mrb[3].mxu0 }
  0xdf   :  { %v331_v25 = vmul.f32 -1.442695, %v239_v18  ;;  %v224_v26 = vadd.f32 %v223_v24, %v123_v23 }
  0xe0   :  { %367 = vpow2.f32 %v332_v21  ;;  %v242_v27 = vadd.f32 %v330_v12, %v229_v22 }
  0xe1   :  { %369 = vpow2.f32 %v331_v25  ;;  %v241_v28 = vadd.f32 %v330_v12, %v224_v26 }
  0xe2   :  { %v334_v29 = vmul.f32 -1.442695, %v242_v27 }
  0xe3   :  { %v333_v30 = vmul.f32 -1.442695, %v241_v28 }
  0xe4   :  { %371 = vpow2.f32 %v334_v29 }
  0xe5   :  { %373 = vpow2.f32 %v333_v30 }
  0xea   :  { %v368_v31 = vpop.eup %367 }
  0xeb   :  { %v370_v32 = vpop.eup %369  ;;  %v256_v33 = vadd.f32 1.0, %v368_v31 }
  0xec   :  { %v255_v34 = vadd.f32 1.0, %v370_v32 }
  0xed   :  { %375 = vrcp.f32 %v256_v33 }
  0xee   :  { %v372_v35 = vpop.eup %371  ;;  %377 = vrcp.f32 %v255_v34 }
  0xef   :  { %v374_v36 = vpop.eup %373  ;;  %v258_v37 = vadd.f32 1.0, %v372_v35 }
  0xf0   :  { %v257_v38 = vadd.f32 1.0, %v374_v36 }
  0xf1   :  { %379 = vrcp.f32 %v258_v37 }
  0xf2   :  { %381 = vrcp.f32 %v257_v38 }
  0xf7   :  { %v376_v39 = vpop.eup %375 }
  0xf8   :  { %v378_v40 = vpop.eup %377  ;;  %v268_v41 = vmul.f32 %v376_v39, %v21_v5 }
  0xf9   :  { %279 = vrot.lane.b32.xlu0 %v378_v40, %s383_s0  ;;  %v267_v42 = vmul.f32 %v378_v40, %v20_v3 }
  0xfa   :  { %272 = vst.msk [vmem:[%s513_s5 + $0x8] sm:$0xff] %vm30_vm1, %v268_v41 }
  0xfb   :  { %v380_v43 = vpop.eup %379  ;;  %271 = vst.msk [vmem:[%s513_s5] sm:$0xff] %vm30_vm1, %v267_v42 }
  0xfc   :  { %v382_v44 = vpop.eup %381  ;;  %v270_v45 = vmul.f32 %v380_v43, %v23_v9 }
  0xfd   :  { %283 = vrot.lane.b32.xlu1 %v382_v44, %s383_s0  ;;  %281 = vrot.lane.b32.xlu0 %v376_v39, %s383_s0  ;;  %v269_v46 = vmul.f32 %v382_v44, %v450_v7 }
  0xfe   :  { %274 = vst.msk [vmem:[%s513_s5 + $0x18] sm:$0xff] %vm30_vm1, %v270_v45 }
  0xff   :  { %273 = vst.msk [vmem:[%s513_s5 + $0x10] sm:$0xff] %vm30_vm1, %v269_v46 }
 0x101   :  { %285 = vrot.lane.b32.xlu1 %v380_v43, %s383_s0 }
 0x16b   :  { %v280_v47 = vpop.permute.xlu0 %279 }
 0x16c   :  { %v291_v48 = vmul.f32 %v280_v47, %v424_v2 }
 0x16e   :  { %299 = vrot.lane.b32.xlu0 %v291_v48, %s384_s19 }
 0x16f   :  { %v284_v49 = vpop.permute.xlu1 %283  ;;  %v282_v50 = vpop.permute.xlu0 %281 }
 0x170   :  { %v293_v51 = vmul.f32 %v284_v49, %v445_v6  ;;  %v292_v52 = vmul.f32 %v282_v50, %v434_v4 }
 0x172   :  { %303 = vrot.lane.b32.xlu0 %v293_v51, %s384_s19  ;;  %301 = vrot.lane.b32.xlu1 %v292_v52, %s384_s19 }
 0x173   :  { %v286_v53 = vpop.permute.xlu1 %285 }
 0x174   :  { %v294_v54 = vmul.f32 %v286_v53, %v464_v8 }
 0x176   :  { %305 = vrot.lane.b32.xlu1 %v294_v54, %s384_s19 }
 0x1e0   :  { %v300_v55 = vpop.permute.xlu0 %299 }
 0x1e1   :  { %312 = vst.msk [vmem:[%s513_s5] sm:$0xff] %vm311_vm2, %v300_v55 }
 0x1e4   :  { %v302_v56 = vpop.permute.xlu1 %301  ;;  %v304_v57 = vpop.permute.xlu0 %303 }
 0x1e5   :  { %313 = vst.msk [vmem:[%s513_s5 + $0x8] sm:$0xff] %vm311_vm2, %v302_v56  ;;  %314 = vst.msk [vmem:[%s513_s5 + $0x10] sm:$0xff] %vm311_vm2, %v304_v57 }
 0x1e8   :  { %v306_v58 = vpop.permute.xlu1 %305 }
 0x1e9   :  { %315 = vst.msk [vmem:[%s513_s5 + $0x18] sm:$0xff] %vm311_vm2, %v306_v58 }

</bundles_post_ra>
